<compile_context>
chip_gen: v7x
topology: tpu7x:2x2x1
jax: 0.10.0
libtpu: 0.0.40
codegen_flags: <defaults>
</compile_context>

<pallas_src>
import jax
import jax.numpy as jnp
from jax.experimental import pallas as pl
from jax.experimental.pallas import tpu as pltpu

NEG_SLOPE = 0.01          # nn.LeakyReLU() default
LANE = 128                # TPU lane width
BATCH_ALIGN = 16          # bf16 sublane packing (16 rows per vreg)
NEG_BIG = -1e30           # "-inf" bias for padded logit columns -> exp() == 0


def _round_up(v, m):
    return (v + m - 1) // m * m


def _leaky_relu(x):
    return jnp.where(x > 0, x, NEG_SLOPE * x)


def mlp_kernel(x_ref, w1_ref, b1_ref, w2_ref, b2_ref, w3_ref, b3_ref, o_ref):
    """Fused MLP + LeakyReLU + softmax for one batch tile.

    x arrives in f32 (unpadded feature dim) and is cast to bf16 here; matmul
    operands are bf16 (MXU-native), while accumulation, bias adds, LeakyReLU
    and the softmax all run in f32.  The result is stored as bf16, lane-dense.
    """
    x = x_ref[...].astype(jnp.bfloat16)                           # (tile_b, D_in)

    h1 = jnp.dot(x, w1_ref[...], preferred_element_type=jnp.float32) + b1_ref[...]
    h1 = _leaky_relu(h1)

    h2 = jnp.dot(h1.astype(jnp.bfloat16), w2_ref[...],
                 preferred_element_type=jnp.float32) + b2_ref[...]
    h2 = _leaky_relu(h2)

    logits = jnp.dot(h2.astype(jnp.bfloat16), w3_ref[...],
                     preferred_element_type=jnp.float32) + b3_ref[...]

    # Softmax over the (padded, lane-dense) feature axis.  Padded columns carry
    # a -1e30 bias so exp() underflows to exactly 0 and they drop out of the
    # sum.  Exact f32 division keeps row sums at 1 (approx reciprocal did not).
    m = jnp.max(logits, axis=-1, keepdims=True)
    e = jnp.exp(logits - m)
    denom = jnp.sum(e, axis=-1, keepdims=True)
    o_ref[...] = (e / denom).astype(o_ref.dtype)


def prepare_params(params):
    """One-time weight/bias prep (pad to lane width + bf16 cast), hoisted out of
    the per-call path so mlp_forward only touches x."""
    w1, b1, w2, b2, w3, b3 = params
    D_in, H = w1.shape
    D_out = w3.shape[1]
    Hp = _round_up(H, LANE)
    Dp_out = _round_up(D_out, LANE)

    w1p = jnp.pad(w1, ((0, 0), (0, Hp - H))).astype(jnp.bfloat16)      # (D_in, Hp)
    b1p = jnp.pad(b1.astype(jnp.float32), ((0, 0), (0, Hp - H)))
    w2p = jnp.pad(w2, ((0, Hp - H), (0, Hp - H))).astype(jnp.bfloat16)
    b2p = jnp.pad(b2.astype(jnp.float32), ((0, 0), (0, Hp - H)))
    w3p = jnp.pad(w3, ((0, Hp - H), (0, Dp_out - D_out))).astype(jnp.bfloat16)
    # Padded output columns get a huge negative bias so softmax ignores them.
    b3p = jnp.pad(b3.astype(jnp.float32), ((0, 0), (0, Dp_out - D_out)),
                  constant_values=NEG_BIG)
    return (w1p, b1p, w2p, b2p, w3p, b3p), (D_in, H, D_out)


def mlp_forward(x, prepared, *, tile_b=None):
    """x: [B, input_size] float32 -> [B, 2] float32 (softmax probabilities)."""
    (w1p, b1p, w2p, b2p, w3p, b3p), (D_in, H, D_out) = prepared
    B = x.shape[0]
    assert x.shape[1] == D_in
    Hp = w1p.shape[1]
    Dp_out = w3p.shape[1]
    x = x.astype(jnp.float32)

    # Batch tiling: big tiles amortize the ~0.35 us per-grid-step overhead.
    # For B > 256 we always use >= 2 grid steps (cap 2048 rows/tile) so the
    # "parallel" batch axis can be sharded across both v7x TensorCores.
    if tile_b is None:
        tile_b = B if B <= 256 else min(2048, _round_up(pl.cdiv(B, 2), BATCH_ALIGN))
    if tile_b >= B:
        tile_b = B                      # whole batch in one tile, no padding
        Bp = B
    else:
        tile_b = _round_up(tile_b, BATCH_ALIGN)
        Bp = _round_up(B, tile_b)
    xp = x if Bp == B else jnp.pad(x, ((0, Bp - B), (0, 0)))

    grid = (Bp // tile_b,)

    # VMEM budget (sized against v7x's 64 MiB physical): resident weights +
    # double-buffered x/out tiles + f32 intermediates, with 2x headroom.
    weight_bytes = ((w1p.size + w2p.size + w3p.size) * 2
                    + (b1p.size + b2p.size + b3p.size) * 4)
    tile_bytes = (2 * tile_b * D_in * 4        # x tile, f32, double-buffered
                  + 2 * tile_b * Dp_out * 2    # out tile, bf16, double-buffered
                  + 6 * tile_b * Hp * 4)       # h1/h2/logits/exp temporaries
    vmem_limit = int(min(max(2 * (2 * weight_bytes + tile_bytes), 16 << 20), 48 << 20))

    # NOTE: weight/bias BlockSpecs have constant index_maps, so Pallas fetches
    # them once and keeps them resident; pipeline_mode=pl.Buffered(1) would be a
    # minor VMEM tidy-up but is intentionally omitted for portability.
    out = pl.pallas_call(
        mlp_kernel,
        out_shape=jax.ShapeDtypeStruct((Bp, Dp_out), jnp.bfloat16),
        grid_spec=pltpu.PrefetchScalarGridSpec(
            num_scalar_prefetch=0,
            grid=grid,
            in_specs=[
                pl.BlockSpec((tile_b, D_in), lambda i: (i, 0)),    # x tile (f32)
                pl.BlockSpec((D_in, Hp), lambda i: (0, 0)),        # w1 (resident)
                pl.BlockSpec((1, Hp), lambda i: (0, 0)),           # b1
                pl.BlockSpec((Hp, Hp), lambda i: (0, 0)),          # w2
                pl.BlockSpec((1, Hp), lambda i: (0, 0)),           # b2
                pl.BlockSpec((Hp, Dp_out), lambda i: (0, 0)),      # w3
                pl.BlockSpec((1, Dp_out), lambda i: (0, 0)),       # b3
            ],
            out_specs=pl.BlockSpec((tile_b, Dp_out), lambda i: (i, 0)),
        ),
        compiler_params=pltpu.CompilerParams(
            dimension_semantics=("parallel",),
            vmem_limit_bytes=vmem_limit,
        ),
    )(xp, w1p, b1p, w2p, b2p, w3p, b3p)

    return out[:B, :D_out].astype(jnp.float32)


def init_params(key, input_size, hidden=64, out=2):
    """Deterministic init mimicking nn.Linear default (uniform +/- 1/sqrt(fan_in))."""
    def linear_init(k, fan_in, fan_out):
        kw, kb = jax.random.split(k)
        bound = 1.0 / jnp.sqrt(fan_in)
        w = jax.random.uniform(kw, (fan_in, fan_out), jnp.float32, -bound, bound)
        b = jax.random.uniform(kb, (1, fan_out), jnp.float32, -bound, bound)
        return w, b

    k1, k2, k3 = jax.random.split(key, 3)
    w1, b1 = linear_init(k1, input_size, hidden)
    w2, b2 = linear_init(k2, hidden, hidden)
    w3, b3 = linear_init(k3, hidden, out)
    return (w1, b1, w2, b2, w3, b3)


# TODO(synk): Model.init_hidden is dead code in the reference (never used by forward,
# references undefined attributes), so it is intentionally not translated.

if __name__ == "__main__":
    key = jax.random.PRNGKey(0)
    k_params, k_x = jax.random.split(key)

    batch, input_size = 2, 32
    params = init_params(k_params, input_size)
    prepared = prepare_params(params)          # one-time weight prep, off hot path
    x = jax.random.normal(k_x, (batch, input_size), jnp.float32)

    y = mlp_forward(x, prepared)
    jax.block_until_ready(y)

    # f32 reference in plain JAX (kernel uses bf16 matmul operands + bf16 output
    # store -> relaxed tolerances).
    w1, b1, w2, b2, w3, b3 = params
    h = x @ w1 + b1
    h = jnp.where(h > 0, h, NEG_SLOPE * h)
    h = h @ w2 + b2
    h = jnp.where(h > 0, h, NEG_SLOPE * h)
    ref = jax.nn.softmax(h @ w3 + b3, axis=1)

    assert y.shape == (batch, 2)
    assert jnp.allclose(y, ref, atol=2e-2), "mismatch vs reference"
    # Exact f32 division inside the kernel; only bf16 output rounding remains.
    assert jnp.allclose(jnp.sum(y, axis=1), 1.0, atol=1e-2)

    print("KERNEL_OK")
</pallas_src>

<mosaic_0001>
module attributes {stable_mosaic.version = 11 : i64} {
  func.func @mlp_kernel(%arg0: i32, %arg1: memref<2x32xf32, #tpu.memory_space<vmem>>, %arg2: memref<32x128xbf16, #tpu.memory_space<vmem>>, %arg3: memref<1x128xf32, #tpu.memory_space<vmem>>, %arg4: memref<128x128xbf16, #tpu.memory_space<vmem>>, %arg5: memref<1x128xf32, #tpu.memory_space<vmem>>, %arg6: memref<128x128xbf16, #tpu.memory_space<vmem>>, %arg7: memref<1x128xf32, #tpu.memory_space<vmem>>, %arg8: memref<2x128xbf16, #tpu.memory_space<vmem>>) attributes {dimension_semantics = [#tpu.dimension_semantics<parallel>], iteration_bounds = array<i64: 1>, scalar_prefetch = 0 : i64, scratch_operands = 0 : i64, tpu.core_type = #tpu.core_type<tc>, window_params = [{transform_indices = @transform_0, window_bounds = array<i64: 2, 32>}, {pipeline_mode = #tpu.pipeline_mode<synchronous>, transform_indices = @transform_1, window_bounds = array<i64: 32, 128>}, {pipeline_mode = #tpu.pipeline_mode<synchronous>, transform_indices = @transform_2, window_bounds = array<i64: 1, 128>}, {pipeline_mode = #tpu.pipeline_mode<synchronous>, transform_indices = @transform_3, window_bounds = array<i64: 128, 128>}, {pipeline_mode = #tpu.pipeline_mode<synchronous>, transform_indices = @transform_4, window_bounds = array<i64: 1, 128>}, {pipeline_mode = #tpu.pipeline_mode<synchronous>, transform_indices = @transform_5, window_bounds = array<i64: 128, 128>}, {pipeline_mode = #tpu.pipeline_mode<synchronous>, transform_indices = @transform_6, window_bounds = array<i64: 1, 128>}, {transform_indices = @transform_7, window_bounds = array<i64: 2, 128>}]} {
    %c0 = arith.constant 0 : index
    %c0_0 = arith.constant 0 : index
    %0 = vector.load %arg1[%c0, %c0_0] : memref<2x32xf32, #tpu.memory_space<vmem>>, vector<2x32xf32>
    %1 = arith.truncf %0 : vector<2x32xf32> to vector<2x32xbf16>
    %c0_1 = arith.constant 0 : index
    %c0_2 = arith.constant 0 : index
    %2 = vector.load %arg2[%c0_1, %c0_2] : memref<32x128xbf16, #tpu.memory_space<vmem>>, vector<32x128xbf16>
    %cst = arith.constant dense<0.000000e+00> : vector<2x128xf32>
    %3 = tpu.matmul %1, %2, %cst {dimension_numbers = #tpu.dot_dimension_numbers<[1], [0], [0], [1], [0, 0, 1, 1], [], []>} : vector<2x32xbf16>, vector<32x128xbf16>, vector<2x128xf32> -> vector<2x128xf32>
    %c0_3 = arith.constant 0 : index
    %c0_4 = arith.constant 0 : index
    %4 = vector.load %arg3[%c0_3, %c0_4] : memref<1x128xf32, #tpu.memory_space<vmem>>, vector<1x128xf32>
    %5 = vector.broadcast %4 : vector<1x128xf32> to vector<2x128xf32>
    %6 = arith.addf %3, %5 : vector<2x128xf32>
    %cst_5 = arith.constant 0.000000e+00 : f32
    %7 = vector.broadcast %cst_5 : f32 to vector<2x128xf32>
    %8 = arith.cmpf ogt, %6, %7 : vector<2x128xf32>
    %cst_6 = arith.constant 0.00999999977 : f32
    %9 = vector.broadcast %cst_6 : f32 to vector<2x128xf32>
    %10 = arith.mulf %9, %6 : vector<2x128xf32>
    %11 = arith.select %8, %6, %10 : vector<2x128xi1>, vector<2x128xf32>
    %12 = arith.truncf %11 : vector<2x128xf32> to vector<2x128xbf16>
    %c0_7 = arith.constant 0 : index
    %c0_8 = arith.constant 0 : index
    %13 = vector.load %arg4[%c0_7, %c0_8] : memref<128x128xbf16, #tpu.memory_space<vmem>>, vector<128x128xbf16>
    %cst_9 = arith.constant dense<0.000000e+00> : vector<2x128xf32>
    %14 = tpu.matmul %12, %13, %cst_9 {dimension_numbers = #tpu.dot_dimension_numbers<[1], [0], [0], [1], [0, 0, 1, 1], [], []>} : vector<2x128xbf16>, vector<128x128xbf16>, vector<2x128xf32> -> vector<2x128xf32>
    %c0_10 = arith.constant 0 : index
    %c0_11 = arith.constant 0 : index
    %15 = vector.load %arg5[%c0_10, %c0_11] : memref<1x128xf32, #tpu.memory_space<vmem>>, vector<1x128xf32>
    %16 = vector.broadcast %15 : vector<1x128xf32> to vector<2x128xf32>
    %17 = arith.addf %14, %16 : vector<2x128xf32>
    %cst_12 = arith.constant 0.000000e+00 : f32
    %18 = vector.broadcast %cst_12 : f32 to vector<2x128xf32>
    %19 = arith.cmpf ogt, %17, %18 : vector<2x128xf32>
    %cst_13 = arith.constant 0.00999999977 : f32
    %20 = vector.broadcast %cst_13 : f32 to vector<2x128xf32>
    %21 = arith.mulf %20, %17 : vector<2x128xf32>
    %22 = arith.select %19, %17, %21 : vector<2x128xi1>, vector<2x128xf32>
    %23 = arith.truncf %22 : vector<2x128xf32> to vector<2x128xbf16>
    %c0_14 = arith.constant 0 : index
    %c0_15 = arith.constant 0 : index
    %24 = vector.load %arg6[%c0_14, %c0_15] : memref<128x128xbf16, #tpu.memory_space<vmem>>, vector<128x128xbf16>
    %cst_16 = arith.constant dense<0.000000e+00> : vector<2x128xf32>
    %25 = tpu.matmul %23, %24, %cst_16 {dimension_numbers = #tpu.dot_dimension_numbers<[1], [0], [0], [1], [0, 0, 1, 1], [], []>} : vector<2x128xbf16>, vector<128x128xbf16>, vector<2x128xf32> -> vector<2x128xf32>
    %c0_17 = arith.constant 0 : index
    %c0_18 = arith.constant 0 : index
    %26 = vector.load %arg7[%c0_17, %c0_18] : memref<1x128xf32, #tpu.memory_space<vmem>>, vector<1x128xf32>
    %27 = vector.broadcast %26 : vector<1x128xf32> to vector<2x128xf32>
    %28 = arith.addf %25, %27 : vector<2x128xf32>
    %cst_19 = arith.constant dense<0xFF800000> : vector<2xf32>
    %29 = vector.multi_reduction <maximumf>, %28, %cst_19 [1] : vector<2x128xf32> to vector<2xf32>
    %30 = vector.shape_cast %29 : vector<2xf32> to vector<2x1xf32>
    %31 = vector.broadcast %30 : vector<2x1xf32> to vector<2x128xf32>
    %32 = arith.subf %28, %31 : vector<2x128xf32>
    %33 = math.exp %32 : vector<2x128xf32>
    %cst_20 = arith.constant dense<0.000000e+00> : vector<2xf32>
    %34 = vector.multi_reduction <add>, %33, %cst_20 [1] : vector<2x128xf32> to vector<2xf32>
    %35 = vector.shape_cast %34 : vector<2xf32> to vector<2x1xf32>
    %36 = vector.broadcast %35 : vector<2x1xf32> to vector<2x128xf32>
    %37 = arith.divf %33, %36 : vector<2x128xf32>
    %38 = arith.truncf %37 : vector<2x128xf32> to vector<2x128xbf16>
    %c0_21 = arith.constant 0 : index
    %c0_22 = arith.constant 0 : index
    %39 = vector.load %arg8[%c0_21, %c0_22] : memref<2x128xbf16, #tpu.memory_space<vmem>>, vector<2x128xbf16>
    tpu.vector_store %arg8[%c0_21, %c0_22], %38 {strides = array<i32>} : memref<2x128xbf16, #tpu.memory_space<vmem>>, vector<2x128xbf16>,
    return
  }
  func.func @transform_0(%arg0: i32) -> (i32, i32) {
    %c0_i32 = arith.constant 0 : i32
    %c0_i32_0 = arith.constant 0 : i32
    return %arg0, %c0_i32 : i32, i32
  }
  func.func @transform_1(%arg0: i32) -> (i32, i32) {
    %c0_i32 = arith.constant 0 : i32
    %c0_i32_0 = arith.constant 0 : i32
    %c0_i32_1 = arith.constant 0 : i32
    return %c0_i32, %c0_i32_0 : i32, i32
  }
  func.func @transform_2(%arg0: i32) -> (i32, i32) {
    %c0_i32 = arith.constant 0 : i32
    %c0_i32_0 = arith.constant 0 : i32
    %c0_i32_1 = arith.constant 0 : i32
    return %c0_i32, %c0_i32_0 : i32, i32
  }
  func.func @transform_3(%arg0: i32) -> (i32, i32) {
    %c0_i32 = arith.constant 0 : i32
    %c0_i32_0 = arith.constant 0 : i32
    %c0_i32_1 = arith.constant 0 : i32
    return %c0_i32, %c0_i32_0 : i32, i32
  }
  func.func @transform_4(%arg0: i32) -> (i32, i32) {
    %c0_i32 = arith.constant 0 : i32
    %c0_i32_0 = arith.constant 0 : i32
    %c0_i32_1 = arith.constant 0 : i32
    return %c0_i32, %c0_i32_0 : i32, i32
  }
  func.func @transform_5(%arg0: i32) -> (i32, i32) {
    %c0_i32 = arith.constant 0 : i32
    %c0_i32_0 = arith.constant 0 : i32
    %c0_i32_1 = arith.constant 0 : i32
    return %c0_i32, %c0_i32_0 : i32, i32
  }
  func.func @transform_6(%arg0: i32) -> (i32, i32) {
    %c0_i32 = arith.constant 0 : i32
    %c0_i32_0 = arith.constant 0 : i32
    %c0_i32_1 = arith.constant 0 : i32
    return %c0_i32, %c0_i32_0 : i32, i32
  }
  func.func @transform_7(%arg0: i32) -> (i32, i32) {
    %c0_i32 = arith.constant 0 : i32
    %c0_i32_0 = arith.constant 0 : i32
    return %arg0, %c0_i32 : i32, i32
  }
}

</mosaic_0001>

<bundles_post_ra>
// kernel: tpu_custom_call.1
= control target key start
LH: loop header
LB: loop body
LE: loop exit
PB: predicated region body
PF: predicated region fallthrough
CT: control target
= control target key end

     0   :  { %12 = vsyncpa [#allocation3], 0  ;;  %s802_s0 = inlined_call_operand.hbm [shape: f32[2,32], index: 0, kind: input, shape index: {}]   ;;  %s803_s1 = inlined_call_operand.hbm [shape: bf16[32,128], index: 1, kind: input, shape index: {}]   ;;  %s804_s2 = inlined_call_operand.vmem [shape: f32[1,128], index: 2, kind: input, shape index: {}]   ;;  %s805_s3 = inlined_call_operand.hbm [shape: bf16[128,128], index: 3, kind: input, shape index: {}]   ;;  %s806_s4 = inlined_call_operand.vmem [shape: f32[1,128], index: 4, kind: input, shape index: {}]   ;;  %s807_s5 = inlined_call_operand.hbm [shape: bf16[128,128], index: 5, kind: input, shape index: {}]   ;;  %s808_s6 = inlined_call_operand.vmem [shape: f32[1,128], index: 6, kind: input, shape index: {}]   ;;  %s809_s7 = inlined_call_operand.hbm [shape: bf16[2,128], index: 7, kind: output, shape index: {}]  }
   0x1   :  { %13 = vsyncpa [#allocation6], 0 }
   0x2   :  { %14 = vsyncpa [#allocation9], 0 }
   0x3   :  { %15 = vsyncpa [#allocation4], 0  ;;  %s651_s24 = smov [#allocation5]   ;;  %s533_s28 = scalar_lea.hbm %s803_s1, 256 }
   0x4   :  { %s31_s25 = sshll.u32 %s651_s24, 4  ;;  %p534_p0 = scmp.ne.s32.totalorder %s803_s1, %s533_s28  ;;  %s32_s25 = int_to_ptr.vmem [resolvable:$true] %s31_s25 }
   0x5   :  { %p537_p1 = scmp.lt.u32.totalorder %s533_s28, %s803_s1 }
   0x7   :  { %p539_p2 = pnand %p537_p1, %p534_p0 }
   0x9   :  { %542 = shalt.err (!%p539_p2)
}
   0xa   :  { %s543_s10 = scalar_lea.vmem %s32_s25, 256  ;;  %p548_p4 = scmp.lt.s32.totalorder %s32_s25, %s32_s25 }
   0xb   :  { %p544_p3 = scmp.ne.s32.totalorder %s32_s25, %s543_s10  ;;  %p549_p5 = scmp.lt.s32.totalorder %s543_s10, %s543_s10 }
   0xd   :  { %p550_p6 = por %p549_p5, %p548_p4 }
   0xf   :  { %p551_p7 = pnand %p550_p6, %p544_p3 }
  0x11   :  { %554 = shalt.err (!%p551_p7)
}
  0x12   :  { %s652_s11 = smov 64   ;;  %s653_s12 = smov 4  }
  0x13   :  { %37 = dma.hbm_to_vmem [thread:$0]  %s803_s1, 256, %s32_s25, [#allocation6], %s652_s11, %s652_s11, %s653_s12  }
  0x14   :  { %s654_s15 = smov [#allocation2]   ;;  %s655_s17 = smov [#allocation7]  }
  0x15   :  { %s22_s16 = sshll.u32 %s654_s15, 4  ;;  %s45_s18 = sshll.u32 %s655_s17, 4  ;;  %s23_s16 = int_to_ptr.vmem [resolvable:$true] %s22_s16  ;;  %s46_s18 = int_to_ptr.vmem [resolvable:$true] %s45_s18 }
  0x16   :  { %s555_s21 = scalar_lea.hbm %s802_s0, 32 }
  0x17   :  { %p556_p8 = scmp.ne.s32.totalorder %s802_s0, %s555_s21  ;;  %p559_p9 = scmp.lt.u32.totalorder %s555_s21, %s802_s0 }
  0x19   :  { %p561_p10 = pnand %p559_p9, %p556_p8 }
  0x1b   :  { %564 = shalt.err (!%p561_p10)
}
  0x1c   :  { %s565_s1 = scalar_lea.vmem %s23_s16, 32  ;;  %p570_p12 = scmp.lt.s32.totalorder %s23_s16, %s23_s16 }
  0x1d   :  { %p566_p11 = scmp.ne.s32.totalorder %s23_s16, %s565_s1  ;;  %p571_p13 = scmp.lt.s32.totalorder %s565_s1, %s565_s1 }
  0x1f   :  { %p572_p0 = por %p571_p13, %p570_p12 }
  0x21   :  { %p573_p1 = pnand %p572_p0, %p566_p11 }
  0x23   :  { %576 = shalt.err (!%p573_p1)
}
  0x24   :  { %25 = dma.hbm_to_vmem [thread:$0]  %s802_s0, 32, %s23_s16, [#allocation3]  }
  0x25   :  { %s577_s30 = scalar_lea.hbm %s805_s3, 1024 }
  0x26   :  { %p578_p2 = scmp.ne.s32.totalorder %s805_s3, %s577_s30  ;;  %p581_p3 = scmp.lt.u32.totalorder %s577_s30, %s805_s3 }
  0x28   :  { %p583_p4 = pnand %p581_p3, %p578_p2 }
  0x2a   :  { %586 = shalt.err (!%p583_p4)
}
  0x2b   :  { %s587_s14 = scalar_lea.vmem %s46_s18, 1024  ;;  %p592_p6 = scmp.lt.s32.totalorder %s46_s18, %s46_s18 }
  0x2c   :  { %p588_p5 = scmp.ne.s32.totalorder %s46_s18, %s587_s14  ;;  %p593_p7 = scmp.lt.s32.totalorder %s587_s14, %s587_s14 }
  0x2e   :  { %p594_p8 = por %p593_p7, %p592_p6 }
  0x30   :  { %p595_p9 = pnand %p594_p8, %p588_p5 }
  0x32   :  { %598 = shalt.err (!%p595_p9)
}
  0x33   :  { %51 = dma.hbm_to_vmem [thread:$0]  %s805_s3, 1024, %s46_s18, [#allocation6], %s652_s11, %s652_s11, %s653_s12  }
  0x34   :  { %s656_s16 = smov [#allocation8]   ;;  %s599_s21 = scalar_lea.hbm %s807_s5, 1024 }
  0x35   :  { %s59_s17 = sshll.u32 %s656_s16, 4  ;;  %p600_p10 = scmp.ne.s32.totalorder %s807_s5, %s599_s21  ;;  %s60_s17 = int_to_ptr.vmem [resolvable:$true] %s59_s17 }
  0x36   :  { %p603_p11 = scmp.lt.u32.totalorder %s599_s21, %s807_s5 }
  0x38   :  { %p605_p12 = pnand %p603_p11, %p600_p10 }
  0x3a   :  { %608 = shalt.err (!%p605_p12)
}
  0x3b   :  { %s609_s1 = scalar_lea.vmem %s60_s17, 1024  ;;  %p614_p0 = scmp.lt.s32.totalorder %s60_s17, %s60_s17 }
  0x3c   :  { %p610_p13 = scmp.ne.s32.totalorder %s60_s17, %s609_s1  ;;  %p615_p1 = scmp.lt.s32.totalorder %s609_s1, %s609_s1 }
  0x3e   :  { %p616_p2 = por %p615_p1, %p614_p0 }
  0x40   :  { %p617_p3 = pnand %p616_p2, %p610_p13 }
  0x42   :  { %620 = shalt.err (!%p617_p3)
}
  0x43   :  { %65 = dma.hbm_to_vmem [thread:$0]  %s807_s5, 1024, %s60_s17, [#allocation9], %s652_s11, %s652_s11, %s653_s12  }
  0x44   :  { %643 = dma.done.wait [#allocation3], 32  }
  0x45   :  { %644 = vsyncadd [#allocation3], 4294967264 }
  0x46   :  { %645 = dma.done.wait [#allocation6], 1280  }
  0x47   :  { %646 = vsyncadd [#allocation6], 4294966016 }
  0x48   :  { %647 = dma.done.wait [#allocation9], 1024  }
  0x49   :  { %648 = vsyncadd [#allocation9], 4294966272  ;;  %v657_v0 = vmov 0.0   ;;  %vm658_vm0 = vmmov 0   ;;  %v511_v1 = vld [vmem:[#allocation5] sm:$0xff]   ;;  %v512_v2 = vld [vmem:[#allocation5 + $0x8] sm:$0xff]  }
  0x4a   :  { %454 = vmatprep.subr.bf16.mxu0 %v657_v0  ;;  %458 = vmatprep.mubr.msk.bf16.mxu0 %vm658_vm0, %v657_v0  ;;  %v81_v3 = vld [vmem:[#allocation2] sm:$0x3]  ;;  %v513_v4 = vld [vmem:[#allocation7] sm:$0xff]   ;;  %vm106_vm1 = vcmask 261120   ;;  %v515_v7 = vld [vmem:[#allocation7 + $0x10] sm:$0xff]   ;;  %vm380_vm4 = vcmask 1041408  }
  0x4b   :  { %462 = vmatprep.subr.bf16.mxu1 %v657_v0  ;;  %478 = vmatprep.mubr.msk.bf16.mxu1 %vm658_vm0, %v657_v0  ;;  %v82_v5 = vpack.c.bf16 %v81_v3, %v81_v3  ;;  %v514_v6 = vld [vmem:[#allocation7 + $0x8] sm:$0xff]   ;;  %v516_v8 = vld [vmem:[#allocation7 + $0x18] sm:$0xff]   ;;  %v517_v9 = vld [vmem:[#allocation7 + $0x20] sm:$0xff]  }
  0x4c   :  { %455 = vmatpush3.bf16.msra.mxu0 %v511_v1  ;;  %463 = vmatpush3.bf16.msra.mxu1 %v513_v4  ;;  %v518_v10 = vld [vmem:[#allocation7 + $0x28] sm:$0xff]   ;;  %v519_v11 = vld [vmem:[#allocation7 + $0x30] sm:$0xff]   ;;  %v520_v12 = vld [vmem:[#allocation7 + $0x38] sm:$0xff]  }
  0x4d   :  { %456 = vmatprep.subr.bf16.mxu0 %v657_v0  ;;  %464 = vmatprep.subr.bf16.mxu1 %v657_v0  ;;  %v521_v13 = vld [vmem:[#allocation8] sm:$0xff]   ;;  %v522_v14 = vld [vmem:[#allocation8 + $0x8] sm:$0xff]   ;;  %v523_v15 = vld [vmem:[#allocation8 + $0x10] sm:$0xff]  }
  0x4e   :  { %v524_v16 = vld [vmem:[#allocation8 + $0x18] sm:$0xff]   ;;  %v525_v17 = vld [vmem:[#allocation8 + $0x20] sm:$0xff]   ;;  %v526_v18 = vld [vmem:[#allocation8 + $0x28] sm:$0xff]  }
  0x4f   :  { %v411_v19 = vld [vmem:[%s804_s2] ss:$0 sm:$0xff]  ;;  %v527_v28 = vld [vmem:[#allocation8 + $0x30] sm:$0xff]   ;;  %v528_v29 = vld [vmem:[#allocation8 + $0x38] sm:$0xff]  }
  0x50   :  { %457 = vmatpush3.bf16.msra.mxu0 %v512_v2  ;;  %465 = vmatpush3.bf16.msra.mxu1 %v514_v6  ;;  %v415_v30 = vld [vmem:[%s806_s4] ss:$0 sm:$0xff]  ;;  %s659_s4 = smov [#allocation10]  }
  0x51   :  { %482 = vmatprep.subr.bf16.mxu0 %v657_v0  ;;  %466 = vmatprep.subr.bf16.mxu1 %v657_v0  ;;  %v424_v39 = vld [vmem:[%s808_s6] ss:$0 sm:$0xff]  ;;  %s400_s6 = sshll.u32 %s659_s4, 4  ;;  %s401_s6 = int_to_ptr.vmem [resolvable:$true] %s400_s6 }
  0x52   :  { %s621_s28 = scalar_lea.vmem %s401_s6, 16  ;;  %s625_s29 = scalar_lea.vmem %s401_s6, 32 }
  0x53   :  { %459 = vmatmul.mubr.msk.bf16.vlgmr.msra.gmra.mrb[0].mxu0 %vm106_vm1, %v82_v5  ;;  %p622_p4 = scmp.ne.s32.totalorder %s401_s6, %s621_s28  ;;  %p626_p5 = scmp.lt.s32.totalorder %s401_s6, %s401_s6 }
  0x54   :  { %498 = vmatprep.mubr.msk.bf16.mxu0 %vm658_vm0, %v657_v0  ;;  %467 = vmatpush3.bf16.msra.mxu1 %v515_v7  ;;  %p627_p6 = scmp.lt.s32.totalorder %s625_s29, %s621_s28 }
  0x55   :  { %468 = vmatprep.subr.bf16.mxu1 %v657_v0  ;;  %483 = vmatpush3.bf16.msra.mxu0 %v521_v13 }
  0x56   :  { %484 = vmatprep.subr.bf16.mxu0 %v657_v0  ;;  %p628_p7 = por %p627_p6, %p626_p5 }
  0x58   :  { %469 = vmatpush3.bf16.msra.mxu1 %v516_v8  ;;  %p629_p8 = pnand %p628_p7, %p622_p4 }
  0x59   :  { %470 = vmatprep.subr.bf16.mxu1 %v657_v0  ;;  %485 = vmatpush3.bf16.msra.mxu0 %v522_v14 }
  0x5a   :  { %486 = vmatprep.subr.bf16.mxu0 %v657_v0 }
  0x5c   :  { %471 = vmatpush3.bf16.msra.mxu1 %v517_v9 }
  0x5d   :  { %472 = vmatprep.subr.bf16.mxu1 %v657_v0  ;;  %487 = vmatpush3.bf16.msra.mxu0 %v523_v15 }
  0x5e   :  { %488 = vmatprep.subr.bf16.mxu0 %v657_v0 }
  0x60   :  { %473 = vmatpush3.bf16.msra.mxu1 %v518_v10 }
  0x61   :  { %474 = vmatprep.subr.bf16.mxu1 %v657_v0  ;;  %489 = vmatpush3.bf16.msra.mxu0 %v524_v16 }
  0x62   :  { %490 = vmatprep.subr.bf16.mxu0 %v657_v0 }
  0x64   :  { %475 = vmatpush3.bf16.msra.mxu1 %v519_v11 }
  0x65   :  { %476 = vmatprep.subr.bf16.mxu1 %v657_v0  ;;  %491 = vmatpush3.bf16.msra.mxu0 %v525_v17 }
  0x66   :  { %492 = vmatprep.subr.bf16.mxu0 %v657_v0 }
  0x68   :  { %477 = vmatpush3.bf16.msra.mxu1 %v520_v12 }
  0x69   :  { %493 = vmatpush3.bf16.msra.mxu0 %v526_v18 }
  0x6a   :  { %494 = vmatprep.subr.bf16.mxu0 %v657_v0 }
  0x6d   :  { %495 = vmatpush3.bf16.msra.mxu0 %v527_v28 }
  0x6e   :  { %496 = vmatprep.subr.bf16.mxu0 %v657_v0 }
  0x71   :  { %497 = vmatpush3.bf16.msra.mxu0 %v528_v29 }
 0x126   :  { %v144_v20 = vpop.f32.mrb[0].mxu0 }
 0x127   :  { %v145_v21 = vadd.f32 %v411_v19, %v144_v20  ;;  %v460_v22 = vpop.f32.mrb[1].mxu0 }
 0x128   :  { %v147_v23 = vpop.f32.mrb[2].mxu0 }
 0x129   :  { %vm150_vm2 = vcmp.gt.f32.partialorder %v145_v21, 0.0  ;;  %v151_v24 = vmul.f32 0.01, %v145_v21  ;;  %v461_v25 = vpop.f32.mrb[3].mxu0 }
 0x12b   :  { %v152_v26 = vsel %vm150_vm2, %v145_v21, %v151_v24 }
 0x12c   :  { %v153_v27 = vpack.c.bf16 %v152_v26, %v152_v26 }
 0x12e   :  { %479 = vmatmul.mubr.bf16.vlgmr.msra.gmra.mrb[0].mxu1 %v153_v27 }
 0x201   :  { %v259_v31 = vpop.f32.mrb[0].mxu1 }
 0x202   :  { %v260_v32 = vadd.f32 %v415_v30, %v259_v31  ;;  %v480_v33 = vpop.f32.mrb[1].mxu1 }
 0x203   :  { %v262_v34 = vpop.f32.mrb[2].mxu1 }
 0x204   :  { %vm265_vm3 = vcmp.gt.f32.partialorder %v260_v32, 0.0  ;;  %v266_v35 = vmul.f32 0.01, %v260_v32  ;;  %v481_v36 = vpop.f32.mrb[3].mxu1 }
 0x206   :  { %v267_v37 = vsel %vm265_vm3, %v260_v32, %v266_v35 }
 0x207   :  { %v268_v38 = vpack.c.bf16 %v267_v37, %v267_v37 }
 0x209   :  { %499 = vmatmul.mubr.bf16.vlgmr.msra.gmra.mrb[4].mxu0 %v268_v38 }
 0x2dc   :  { %v374_v40 = vpop.f32.mrb[4].mxu0 }
 0x2dd   :  { %v375_v41 = vadd.f32 %v424_v39, %v374_v40  ;;  %v500_v42 = vpop.f32.mrb[5].mxu0 }
 0x2de   :  { %v377_v43 = vpop.f32.mrb[6].mxu0 }
 0x2df   :  { %v501_v44 = vpop.f32.mrb[7].mxu0  ;;  %v381_v45 = vsel %vm380_vm4, %v375_v41, -inf }
 0x2e0   :  { %382 = vmax.xlane.f32.xlu0 %v381_v45 }
 0x36d   :  { %v383_v46 = vpop.xlane.xlu0 %382 }
 0x36e   :  { %v384_v47 = vsub.f32 %v375_v41, %v383_v46 }
 0x370   :  { %v385_v48 = vmul.f32 1.442695, %v384_v47 }
 0x372   :  { %529 = vpow2.f32 %v385_v48 }
 0x37c   :  { %v530_v49 = vpop.eup %529 }
 0x37d   :  { %v387_v50 = vsel %vm380_vm4, %v530_v49, 0.0 }
 0x37e   :  { %388 = vadd.xlane.f32.xlu0 %v387_v50 }
 0x40b   :  { %v389_v51 = vpop.xlane.xlu0 %388 }
 0x40c   :  { %531 = vrcp.f32 %v389_v51 }
 0x416   :  { %v532_v52 = vpop.eup %531 }
 0x417   :  { %v391_v53 = vmul.f32 %v532_v52, %v530_v49 }
 0x419   :  { %v392_v54 = vpack.c.bf16 %v391_v53, %v391_v53 }
 0x41b   :  { %393 = vst [vmem:[#allocation10] sm:$0x1] %v392_v54 }
 0x41c   :  { %632 = shalt.err (!%p629_p8)
}
 0x41d   :  { %s633_s9 = scalar_lea.hbm %s809_s7, 16 }
 0x41e   :  { %p634_p9 = scmp.ne.s32.totalorder %s809_s7, %s633_s9  ;;  %p637_p10 = scmp.lt.u32.totalorder %s633_s9, %s809_s7 }
 0x420   :  { %p639_p11 = pnand %p637_p10, %p634_p9 }
 0x422   :  { %642 = shalt.err (!%p639_p11)
}
 0x423   :  { %403 = dma.vmem_to_hbm [thread:$0]  %s401_s6, 16, %s809_s7, [#allocation4]  }
 0x424   :  { %649 = dma.done.wait [#allocation4], 16  }
 0x425   :  { %650 = vsyncadd [#allocation4], 4294967280 }
 0x426   :  { %407 = vsyncpa [#allocation3], 1 }
 0x427   :  { %408 = vsyncpa [#allocation6], 1 }
 0x428   :  { %409 = vsyncpa [#allocation9], 1 }
 0x429   :  { %410 = vsyncpa [#allocation4], 1 }

</bundles_post_ra>
